<compile_context>
chip_gen: v5e
topology: v5e:2x2
jax: 0.10.0
libtpu: 0.0.40
codegen_flags: <defaults>
</compile_context>

<pallas_src>
import functools

import jax
import jax.numpy as jnp
from jax.experimental import pallas as pl
from jax.experimental.pallas import tpu as pltpu

F32 = jnp.float32
BF16 = jnp.bfloat16
LANE = 128                       # lane-dense padding for narrow output heads


# ----------------------------------------------------------------------------
# Generation-aware budgets & tiling helpers
# ----------------------------------------------------------------------------
@functools.lru_cache(maxsize=1)
def _hw_budget():
    """(vmem_limit_bytes, mel/text time-tile cap), derived from the chip."""
    vmem_bytes = 64 * 1024 * 1024
    try:
        vmem_bytes = int(pltpu.get_tpu_info().vmem_capacity_bytes)
    except Exception:
        pass
    vmem_limit = max(32 * 1024 * 1024,
                     min(vmem_bytes * 3 // 4, 96 * 1024 * 1024))
    tile_cap = 2048 if vmem_bytes >= 128 * 1024 * 1024 else 1024
    return int(vmem_limit), int(tile_cap)


def _round_up(n, m):
    return ((n + m - 1) // m) * m


def _pad_and_tile(n, cap):
    """Padded extent + tile size.  Small axes: single full-extent block
    (8-aligned).  Large axes: pad to a multiple of 128 and pick the largest
    128-multiple divisor <= cap (never a tiny divisor fallback)."""
    if n <= cap:
        n_pad = _round_up(n, 8)
        return n_pad, n_pad
    n_pad = _round_up(n, 128)
    blocks = n_pad // 128
    best = 1
    for k in range(1, cap // 128 + 1):
        if blocks % k == 0:
            best = k
    return n_pad, best * 128


def _compiler_params(n_axes, vmem_limit):
    return pltpu.CompilerParams(
        dimension_semantics=("parallel",) * n_axes,
        vmem_limit_bytes=int(vmem_limit))


def _pad_head(w, b, pad):
    """Pad a (Din, Dout) head + (Dout,) bias to `pad` output lanes."""
    dout = w.shape[1]
    wp = jnp.zeros((w.shape[0], pad), F32).at[:, :dout].set(w.astype(F32))
    bp = jnp.zeros((1, pad), F32).at[0, :dout].set(b.astype(F32))
    return wp, bp


def _pad_time(x, axis, new_len):
    if x.shape[axis] == new_len:
        return x
    pads = [(0, 0)] * x.ndim
    pads[axis] = (0, new_len - x.shape[axis])
    return jnp.pad(x, pads)


# ----------------------------------------------------------------------------
# Kernel 1: TextEncoder + hoisted conditioning + pitch/energy adaptors.
# ----------------------------------------------------------------------------
def _text_adapt_kernel(emb_ref, tmask_ref, cond_ref,
                       tw_ref, tb_ref, pew_ref, peb_ref,
                       pencw_ref, pencb_ref, eencw_ref, eencb_ref,
                       te_ref, x_ref, pe_ref):
    emb = emb_ref[0]                                     # (tt, H) f32
    tmask = tmask_ref[0]                                 # (tt, 1) f32

    te = jnp.tanh(jnp.dot(emb.astype(BF16), tw_ref[...],
                          preferred_element_type=F32) + tb_ref[...]) * tmask
    te_ref[0] = te.astype(BF16)

    # spk/style conditioning: precomputed (1, H) row, hoisted out of the kernel
    x = te + cond_ref[0]

    # pitch / energy prediction heads packed into one 128-lane matmul
    # TODO(synk): this write could be skipped entirely when neither pitch nor
    # energy predictions are requested; the pitch column is still needed below.
    pe = jnp.dot(x.astype(BF16), pew_ref[...],
                 preferred_element_type=F32) + peb_ref[...]     # (tt, LANE)
    pe_ref[0] = pe.astype(BF16)

    p_col = pe[:, 0:1]                                   # predicted pitch column
    # pitch/energy encodings: VPU broadcast-mults (no K=1 MXU matmul).
    # TODO(synk): reference encodes *pitch* for both paths
    # (energy = energy_predictor.encode(pitch)) — reproduced as written.
    enc = (p_col * pencw_ref[...] + pencb_ref[...]
           + p_col * eencw_ref[...] + eencb_ref[...])
    x_ref[0] = (x + enc).astype(BF16)


def text_encode_adapt(emb, tmask_col, cond_enc, p, *, tt, vmem_limit):
    B, Tt, H = emb.shape
    grid = (B, Tt // tt)
    btile = lambda i, j: (i, j, 0)
    bonly = lambda i, j: (i, 0, 0)
    shared = lambda i, j: (0, 0)

    return pl.pallas_call(
        _text_adapt_kernel,
        grid=grid,
        in_specs=[
            pl.BlockSpec((1, tt, H), btile),             # emb
            pl.BlockSpec((1, tt, 1), btile),             # text mask (col)
            pl.BlockSpec((1, 1, H), bonly),              # hoisted spk+style cond
            pl.BlockSpec((H, H), shared),                # text_w (bf16)
            pl.BlockSpec((1, H), shared),                # text_b
            pl.BlockSpec((H, LANE), shared),             # packed pitch/energy head
            pl.BlockSpec((1, LANE), shared),
            pl.BlockSpec((1, H), shared),                # pitch_enc_w / b
            pl.BlockSpec((1, H), shared),
            pl.BlockSpec((1, H), shared),                # energy_enc_w / b
            pl.BlockSpec((1, H), shared),
        ],
        out_specs=(
            pl.BlockSpec((1, tt, H), btile),             # text_enc (pre-adapt)
            pl.BlockSpec((1, tt, H), btile),             # x (adapted)
            pl.BlockSpec((1, tt, LANE), btile),          # packed pitch/energy preds
        ),
        out_shape=(jax.ShapeDtypeStruct((B, Tt, H), BF16),
                   jax.ShapeDtypeStruct((B, Tt, H), BF16),
                   jax.ShapeDtypeStruct((B, Tt, LANE), BF16)),
        compiler_params=_compiler_params(2, vmem_limit),
    )(emb, tmask_col, cond_enc,
      p["text_w"], p["text_b"], p["pe_w"], p["pe_b"],
      p["penc_w"], p["penc_b"], p["eenc_w"], p["eenc_b"])


# ----------------------------------------------------------------------------
# Kernel 2: ASREncoder (native mel layout -> hidden + symbol logits).
# ----------------------------------------------------------------------------
def _asr_kernel(mel_ref, mmask_ref, w1_ref, b1_ref, w2_ref, b2_ref,
                h_ref, p_ref):
    mel = mel_ref[0]                                     # (n_mels, tm) native
    mmask = mmask_ref[0]                                 # (tm, 1)
    # contract the n_mels axis of both operands: no wrapper-side transpose.
    h = jnp.tanh(jax.lax.dot_general(
        mel.astype(BF16), w1_ref[...],
        dimension_numbers=(((0,), (0,)), ((), ())),
        preferred_element_type=F32) + b1_ref[...]) * mmask          # (tm, H)
    h_ref[0] = h.astype(BF16)
    p_ref[0] = jnp.dot(h.astype(BF16), w2_ref[...],
                       preferred_element_type=F32) + b2_ref[...]


def asr_encode(mel, mmask_col, p, *, tm, vmem_limit):
    B, n_mels, Tm = mel.shape
    H = p["asr_enc_w"].shape[1]
    Vp = p["asr_pred_w"].shape[1]
    grid = (B, Tm // tm)

    btile = lambda i, j: (i, j, 0)
    melmap = lambda i, j: (i, 0, j)
    shared = lambda i, j: (0, 0)

    return pl.pallas_call(
        _asr_kernel,
        grid=grid,
        in_specs=[
            pl.BlockSpec((1, n_mels, tm), melmap),       # mel in native layout
            pl.BlockSpec((1, tm, 1), btile),
            pl.BlockSpec((n_mels, H), shared),
            pl.BlockSpec((1, H), shared),
            pl.BlockSpec((H, Vp), shared),
            pl.BlockSpec((1, Vp), shared),
        ],
        out_specs=(pl.BlockSpec((1, tm, H), btile),
                   pl.BlockSpec((1, tm, Vp), btile)),
        out_shape=(jax.ShapeDtypeStruct((B, Tm, H), BF16),
                   jax.ShapeDtypeStruct((B, Tm, Vp), F32)),
        compiler_params=_compiler_params(2, vmem_limit),
    )(mel, mmask_col, p["asr_enc_w"], p["asr_enc_b"],
      p["asr_pred_w"], p["asr_pred_b"])


# ----------------------------------------------------------------------------
# Kernel 3: soft aligner + MelDecoder fused (alignment stays in VMEM).
# ----------------------------------------------------------------------------
def _align_decode_kernel(t_ref, x_ref, m_ref, trow_ref, mcol_ref, cond_ref,
                         melw_ref, melb_ref, a_ref, o_ref, *, scale):
    t = t_ref[0]                                         # (Tt, H) bf16 pre-adapt
    x = x_ref[0]                                         # (Tt, H) bf16 adapted
    m = m_ref[0]                                         # (tm, H) bf16 mel tile
    trow = trow_ref[0]                                   # (1, Tt) f32
    mcol = mcol_ref[0]                                   # (tm, 1) f32

    # Scores in (Tm, Tt) orientation: softmax over the lane (text) axis; no
    # transpose of the largest operand before the MXU.
    scores = jax.lax.dot_general(
        m, t, dimension_numbers=(((1,), (1,)), ((), ())),
        preferred_element_type=F32) * scale              # (tm, Tt)
    scores = jnp.where(trow > 0.5, scores, jnp.float32(-1e30))
    scores = scores - jnp.max(scores, axis=-1, keepdims=True)
    num = jnp.exp(scores)
    attn = num / jnp.sum(num, axis=-1, keepdims=True)    # exact normalization
    attn = attn * mcol                                   # zero padded mel frames

    # emit alignment once, already in API layout [Tt, tm] (XLU transpose).
    a_ref[0] = jnp.transpose(attn, (1, 0))

    feat = jnp.dot(attn.astype(BF16), x,
                   preferred_element_type=F32)           # (tm, H)
    feat = jnp.tanh(feat + cond_ref[0])                  # hoisted dec conditioning
    mel = jnp.dot(feat.astype(BF16), melw_ref[...],
                  preferred_element_type=F32) + melb_ref[...]
    o_ref[0] = mel * mcol


def align_and_decode(text_enc, x, mel_enc, tmask_row, mmask_col, cond_dec, p,
                     *, tm, vmem_limit):
    B, Tt, H = text_enc.shape
    Tm = mel_enc.shape[1]
    Mp = p["mel_out_w"].shape[1]
    grid = (B, Tm // tm)

    btile = lambda i, j: (i, j, 0)
    bonly = lambda i, j: (i, 0, 0)
    amap = lambda i, j: (i, 0, j)
    shared = lambda i, j: (0, 0)
    kernel = functools.partial(_align_decode_kernel, scale=1.0 / float(H) ** 0.5)

    return pl.pallas_call(
        kernel,
        grid=grid,
        in_specs=[
            pl.BlockSpec((1, Tt, H), bonly),             # text_enc (bf16)
            pl.BlockSpec((1, Tt, H), bonly),             # adapted x (bf16)
            pl.BlockSpec((1, tm, H), btile),             # mel_enc tile (bf16)
            pl.BlockSpec((1, 1, Tt), bonly),             # text mask (row)
            pl.BlockSpec((1, tm, 1), btile),             # mel mask (col)
            pl.BlockSpec((1, 1, H), bonly),              # hoisted dec conditioning
            pl.BlockSpec((H, Mp), shared),               # mel head (bf16, padded)
            pl.BlockSpec((1, Mp), shared),
        ],
        out_specs=(pl.BlockSpec((1, Tt, tm), amap),      # alignment, API layout
                   pl.BlockSpec((1, tm, Mp), btile)),    # mel (lane-dense)
        out_shape=(jax.ShapeDtypeStruct((B, Tt, Tm), F32),
                   jax.ShapeDtypeStruct((B, Tm, Mp), F32)),
        compiler_params=_compiler_params(2, vmem_limit),
    )(text_enc, x, mel_enc, tmask_row, mmask_col, cond_dec,
      p["mel_out_w"], p["mel_out_b"])


# ----------------------------------------------------------------------------
# Parameter packing (done ONCE, not per forward call)
# ----------------------------------------------------------------------------
def prepare_params(raw):
    H = raw["text_w"].shape[1]
    n_mels = raw["mel_out_w"].shape[1]
    vocab = raw["asr_pred_w"].shape[1]

    pe_w = jnp.zeros((H, LANE), F32)
    pe_w = pe_w.at[:, 0:1].set(raw["pitch_pred_w"]).at[:, 1:2].set(raw["energy_pred_w"])
    pe_b = jnp.zeros((1, LANE), F32)
    pe_b = pe_b.at[0, 0].set(raw["pitch_pred_b"][0]).at[0, 1].set(raw["energy_pred_b"][0])

    mel_w, mel_b = _pad_head(raw["mel_out_w"], raw["mel_out_b"], _round_up(n_mels, LANE))
    asr_w, asr_b = _pad_head(raw["asr_pred_w"], raw["asr_pred_b"], _round_up(vocab, LANE))

    return {
        # tables / conditioning weights used in plain JAX (tiny)
        "emb_table": raw["emb_table"].astype(F32),
        "spk_table": raw["spk_table"].astype(F32),
        "spk_w": raw["spk_w"].astype(F32), "spk_b": raw["spk_b"].astype(F32),
        "sty_w": raw["sty_w"].astype(F32), "sty_b": raw["sty_b"].astype(F32),
        "dec_spk_w": raw["dec_spk_w"].astype(F32), "dec_spk_b": raw["dec_spk_b"].astype(F32),
        "dec_sty_w": raw["dec_sty_w"].astype(F32), "dec_sty_b": raw["dec_sty_b"].astype(F32),
        # kernel weights (pre-cast / pre-packed)
        "text_w": raw["text_w"].astype(BF16),
        "text_b": raw["text_b"].reshape(1, H).astype(F32),
        "pe_w": pe_w.astype(BF16), "pe_b": pe_b,
        "penc_w": raw["pitch_enc_w"].reshape(1, H).astype(F32),
        "penc_b": raw["pitch_enc_b"].reshape(1, H).astype(F32),
        "eenc_w": raw["energy_enc_w"].reshape(1, H).astype(F32),
        "eenc_b": raw["energy_enc_b"].reshape(1, H).astype(F32),
        "asr_enc_w": raw["asr_enc_w"].astype(BF16),
        "asr_enc_b": raw["asr_enc_b"].reshape(1, H).astype(F32),
        "asr_pred_w": asr_w.astype(BF16), "asr_pred_b": asr_b,
        "mel_out_w": mel_w.astype(BF16), "mel_out_b": mel_b,
    }


# ----------------------------------------------------------------------------
# SoftAligedConformerTTS forward (glue in plain JAX, hot paths in 3 kernels)
# ----------------------------------------------------------------------------
def soft_aligned_conformer_tts_forward(params, text, text_mask, mel, mel_mask,
                                       style_vec, spk_id=None, pitch=None,
                                       energy=None):
    """Returns lane-dense / time-padded outputs; use narrow_outputs() at the
    consumer boundary to recover exact module shapes (avoids extra HBM passes
    slicing the largest tensors inside the forward)."""
    B, Tt = text.shape
    n_mels, Tm = mel.shape[1], mel.shape[2]
    H = params["text_w"].shape[1]
    vmem_limit, cap = _hw_budget()

    # --- time padding to tile multiples (masked) ---
    Tt_pad, tt = _pad_and_tile(Tt, cap)
    Tm_pad, tm = _pad_and_tile(Tm, cap)
    text = _pad_time(text, 1, Tt_pad)
    text_mask = _pad_time(text_mask.astype(F32), 1, Tt_pad)
    mel = _pad_time(mel.astype(F32), 2, Tm_pad)
    mel_mask = _pad_time(mel_mask.astype(F32), 1, Tm_pad)

    tmask_col = text_mask.reshape(B, Tt_pad, 1)
    tmask_row = text_mask.reshape(B, 1, Tt_pad)
    mmask_col = mel_mask.reshape(B, Tm_pad, 1)

    # --- embedding gather + hoisted M=1 conditioning projections (plain JAX) ---
    emb = jnp.take(params["emb_table"], text, axis=0).astype(F32)       # [B,Tt,H]
    cond_enc = jnp.zeros((B, 1, H), F32)
    cond_dec = jnp.zeros((B, 1, H), F32)
    if spk_id is not None:
        spk_emb = jnp.take(params["spk_table"], spk_id, axis=0).reshape(B, 1, -1)
        cond_enc = cond_enc + spk_emb @ params["spk_w"] + params["spk_b"]
        cond_dec = cond_dec + spk_emb @ params["dec_spk_w"] + params["dec_spk_b"]
    if style_vec is not None:
        sty = style_vec.reshape(B, 1, -1).astype(F32)
        cond_enc = cond_enc + sty @ params["sty_w"] + params["sty_b"]
        cond_dec = cond_dec + sty @ params["dec_sty_w"] + params["dec_sty_b"]

    # --- Kernel 1: TextEncoder + adaptor chain (bf16 intermediates) ---
    text_enc, x, pe = text_encode_adapt(emb, tmask_col, cond_enc, params,
                                        tt=tt, vmem_limit=vmem_limit)

    # --- Kernel 2: ASREncoder (native mel layout, no wrapper transpose) ---
    mel_enc, asr_pred = asr_encode(mel, mmask_col, params,
                                   tm=tm, vmem_limit=vmem_limit)

    # --- Kernel 3: soft aligner + MelDecoder ---
    # TODO(synk): `self.aligner` is never constructed in the reference; a
    # masked scaled-dot-product soft alignment (softmax over text) is used.
    alignment, mel_pred = align_and_decode(
        text_enc, x, mel_enc, tmask_row, mmask_col, cond_dec, params,
        tm=tm, vmem_limit=vmem_limit)

    # TODO(synk): if ground-truth pitch/energy is None the reference crashes
    # (encode(None)); here the encodings always use the predicted pitch column.
    pitch_pred = pe[..., 0:1].astype(F32) if pitch is not None else None
    energy_pred = pe[..., 1:2].astype(F32) if energy is not None else None

    return {
        "mel_pred": mel_pred,        # [B, Tm_pad, n_mels padded to 128]
        "alignment": alignment,      # [B, Tt_pad, Tm_pad]  (API layout)
        "asr_pred": asr_pred,        # [B, Tm_pad, vocab padded to 128]
        "pitch_pred": pitch_pred,    # [B, Tt_pad, 1] or None
        "energy_pred": energy_pred,  # [B, Tt_pad, 1] or None
    }


def narrow_outputs(out, *, Tt, Tm, n_mels, vocab):
    """Consumer-boundary slicing of the padded kernel outputs."""
    res = dict(out)
    res["mel_pred"] = out["mel_pred"][:, :Tm, :n_mels]
    res["asr_pred"] = out["asr_pred"][:, :Tm, :vocab]
    res["alignment"] = out["alignment"][:, :Tt, :Tm]
    if out["pitch_pred"] is not None:
        res["pitch_pred"] = out["pitch_pred"][:, :Tt, :]
    if out["energy_pred"] is not None:
        res["energy_pred"] = out["energy_pred"][:, :Tt, :]
    return res


# ----------------------------------------------------------------------------
# Deterministic parameter init + example run
# ----------------------------------------------------------------------------
def init_params(key, *, vocab, H, n_mels, n_spk, spk_dim, style_dim):
    def nrm(k, shape, scale=0.1):
        return scale * jax.random.normal(k, shape, F32)

    ks = jax.random.split(key, 26)
    return {
        "emb_table": nrm(ks[0], (vocab, H)),
        "text_w": nrm(ks[1], (H, H)), "text_b": nrm(ks[2], (H,)),
        "asr_enc_w": nrm(ks[3], (n_mels, H)), "asr_enc_b": nrm(ks[4], (H,)),
        "asr_pred_w": nrm(ks[5], (H, vocab)), "asr_pred_b": nrm(ks[6], (vocab,)),
        "spk_table": nrm(ks[7], (n_spk, spk_dim)),
        "spk_w": nrm(ks[8], (spk_dim, H)), "spk_b": nrm(ks[9], (H,)),
        "sty_w": nrm(ks[10], (style_dim, H)), "sty_b": nrm(ks[11], (H,)),
        "pitch_pred_w": nrm(ks[12], (H, 1)), "pitch_pred_b": nrm(ks[13], (1,)),
        "pitch_enc_w": nrm(ks[14], (1, H)), "pitch_enc_b": nrm(ks[15], (H,)),
        "energy_pred_w": nrm(ks[16], (H, 1)), "energy_pred_b": nrm(ks[17], (1,)),
        "energy_enc_w": nrm(ks[18], (1, H)), "energy_enc_b": nrm(ks[19], (H,)),
        "dec_spk_w": nrm(ks[20], (spk_dim, H)), "dec_spk_b": nrm(ks[21], (H,)),
        "dec_sty_w": nrm(ks[22], (style_dim, H)), "dec_sty_b": nrm(ks[23], (H,)),
        "mel_out_w": nrm(ks[24], (H, n_mels)), "mel_out_b": nrm(ks[25], (n_mels,)),
    }


if __name__ == "__main__":
    B, Tt, Tm, H, n_mels = 2, 8, 16, 128, 16
    vocab, n_spk, spk_dim, style_dim = 40, 4, 16, 16

    key = jax.random.PRNGKey(0)
    k_param, k_text, k_mel, k_style = jax.random.split(key, 4)

    raw_params = init_params(k_param, vocab=vocab, H=H, n_mels=n_mels,
                             n_spk=n_spk, spk_dim=spk_dim, style_dim=style_dim)
    params = prepare_params(raw_params)     # packed/padded/bf16 — once, not per call

    text = jax.random.randint(k_text, (B, Tt), 0, vocab, dtype=jnp.int32)
    text_mask = jnp.stack([jnp.ones((Tt,), F32),
                           jnp.concatenate([jnp.ones((Tt - 2,), F32),
                                            jnp.zeros((2,), F32)])])
    mel = jax.random.normal(k_mel, (B, n_mels, Tm), F32)     # PyTorch NCW layout
    mel_mask = jnp.stack([jnp.ones((Tm,), F32),
                          jnp.concatenate([jnp.ones((Tm - 3,), F32),
                                           jnp.zeros((3,), F32)])])
    style_vec = jax.random.normal(k_style, (B, style_dim), F32)
    spk_id = jnp.array([0, 2], jnp.int32)
    # ground-truth pitch/energy (their presence gates prediction branches)
    pitch = jnp.zeros((B, Tt), F32)
    energy = jnp.zeros((B, Tt), F32)

    out = soft_aligned_conformer_tts_forward(
        params, text, text_mask, mel, mel_mask, style_vec,
        spk_id=spk_id, pitch=pitch, energy=energy)
    out = jax.block_until_ready(out)

    # consumer-boundary narrowing to exact module shapes
    nout = narrow_outputs(out, Tt=Tt, Tm=Tm, n_mels=n_mels, vocab=vocab)

    assert nout["mel_pred"].shape == (B, Tm, n_mels)
    assert nout["alignment"].shape == (B, Tt, Tm)
    assert nout["asr_pred"].shape == (B, Tm, vocab)
    assert nout["pitch_pred"].shape == (B, Tt, 1)
    assert nout["energy_pred"].shape == (B, Tt, 1)
    assert all(bool(jnp.all(jnp.isfinite(v)))
               for v in nout.values() if v is not None)

    # alignment columns for valid mel frames are a proper softmax over text
    col_sums = nout["alignment"].sum(axis=1)                        # [B, Tm]
    ok = jnp.where(mel_mask > 0.5, col_sums, 1.0)
    assert bool(jnp.all(jnp.abs(ok - 1.0) < 1e-3))

    print("KERNEL_OK")
</pallas_src>

<mosaic_0001>
module attributes {stable_mosaic.version = 11 : i64} {
  func.func @_text_adapt_kernel(%arg0: i32, %arg1: i32, %arg2: memref<1x8x128xf32, #tpu.memory_space<vmem>>, %arg3: memref<1x8x1xf32, #tpu.memory_space<vmem>>, %arg4: memref<1x1x128xf32, #tpu.memory_space<vmem>>, %arg5: memref<128x128xbf16, #tpu.memory_space<vmem>>, %arg6: memref<1x128xf32, #tpu.memory_space<vmem>>, %arg7: memref<128x128xbf16, #tpu.memory_space<vmem>>, %arg8: memref<1x128xf32, #tpu.memory_space<vmem>>, %arg9: memref<1x128xf32, #tpu.memory_space<vmem>>, %arg10: memref<1x128xf32, #tpu.memory_space<vmem>>, %arg11: memref<1x128xf32, #tpu.memory_space<vmem>>, %arg12: memref<1x128xf32, #tpu.memory_space<vmem>>, %arg13: memref<1x8x128xbf16, #tpu.memory_space<vmem>>, %arg14: memref<1x8x128xbf16, #tpu.memory_space<vmem>>, %arg15: memref<1x8x128xbf16, #tpu.memory_space<vmem>>) attributes {dimension_semantics = [#tpu.dimension_semantics<parallel>, #tpu.dimension_semantics<parallel>], iteration_bounds = array<i64: 2, 1>, scalar_prefetch = 0 : i64, scratch_operands = 0 : i64, tpu.core_type = #tpu.core_type<tc>, window_params = [{transform_indices = @transform_0, window_bounds = array<i64: 1, 8, 128>}, {transform_indices = @transform_1, window_bounds = array<i64: 1, 8, 1>}, {transform_indices = @transform_2, window_bounds = array<i64: 1, 1, 128>}, {pipeline_mode = #tpu.pipeline_mode<synchronous>, transform_indices = @transform_3, window_bounds = array<i64: 128, 128>}, {pipeline_mode = #tpu.pipeline_mode<synchronous>, transform_indices = @transform_4, window_bounds = array<i64: 1, 128>}, {pipeline_mode = #tpu.pipeline_mode<synchronous>, transform_indices = @transform_5, window_bounds = array<i64: 128, 128>}, {pipeline_mode = #tpu.pipeline_mode<synchronous>, transform_indices = @transform_6, window_bounds = array<i64: 1, 128>}, {pipeline_mode = #tpu.pipeline_mode<synchronous>, transform_indices = @transform_7, window_bounds = array<i64: 1, 128>}, {pipeline_mode = #tpu.pipeline_mode<synchronous>, transform_indices = @transform_8, window_bounds = array<i64: 1, 128>}, {pipeline_mode = #tpu.pipeline_mode<synchronous>, transform_indices = @transform_9, window_bounds = array<i64: 1, 128>}, {pipeline_mode = #tpu.pipeline_mode<synchronous>, transform_indices = @transform_10, window_bounds = array<i64: 1, 128>}, {transform_indices = @transform_11, window_bounds = array<i64: 1, 8, 128>}, {transform_indices = @transform_12, window_bounds = array<i64: 1, 8, 128>}, {transform_indices = @transform_13, window_bounds = array<i64: 1, 8, 128>}]} {
    %c0 = arith.constant 0 : index
    %c0_0 = arith.constant 0 : index
    %c0_1 = arith.constant 0 : index
    %0 = vector.load %arg2[%c0, %c0_0, %c0_1] : memref<1x8x128xf32, #tpu.memory_space<vmem>>, vector<1x8x128xf32>
    %1 = vector.shape_cast %0 : vector<1x8x128xf32> to vector<8x128xf32>
    %c0_2 = arith.constant 0 : index
    %c0_3 = arith.constant 0 : index
    %c0_4 = arith.constant 0 : index
    %2 = vector.load %arg3[%c0_2, %c0_3, %c0_4] : memref<1x8x1xf32, #tpu.memory_space<vmem>>, vector<1x8x1xf32>
    %3 = vector.shape_cast %2 : vector<1x8x1xf32> to vector<8x1xf32>
    %4 = arith.truncf %1 : vector<8x128xf32> to vector<8x128xbf16>
    %c0_5 = arith.constant 0 : index
    %c0_6 = arith.constant 0 : index
    %5 = vector.load %arg5[%c0_5, %c0_6] : memref<128x128xbf16, #tpu.memory_space<vmem>>, vector<128x128xbf16>
    %cst = arith.constant dense<0.000000e+00> : vector<8x128xf32>
    %6 = tpu.matmul %4, %5, %cst {dimension_numbers = #tpu.dot_dimension_numbers<[1], [0], [0], [1], [0, 0, 1, 1], [], []>} : vector<8x128xbf16>, vector<128x128xbf16>, vector<8x128xf32> -> vector<8x128xf32>
    %c0_7 = arith.constant 0 : index
    %c0_8 = arith.constant 0 : index
    %7 = vector.load %arg6[%c0_7, %c0_8] : memref<1x128xf32, #tpu.memory_space<vmem>>, vector<1x128xf32>
    %8 = vector.broadcast %7 : vector<1x128xf32> to vector<8x128xf32>
    %9 = arith.addf %6, %8 : vector<8x128xf32>
    %10 = math.tanh %9 : vector<8x128xf32>
    %11 = vector.broadcast %3 : vector<8x1xf32> to vector<8x128xf32>
    %12 = arith.mulf %10, %11 : vector<8x128xf32>
    %13 = arith.truncf %12 : vector<8x128xf32> to vector<8x128xbf16>
    %c0_9 = arith.constant 0 : index
    %c0_10 = arith.constant 0 : index
    %c0_11 = arith.constant 0 : index
    %14 = vector.load %arg13[%c0_9, %c0_10, %c0_11] : memref<1x8x128xbf16, #tpu.memory_space<vmem>>, vector<1x8x128xbf16>
    %15 = vector.shape_cast %14 : vector<1x8x128xbf16> to vector<8x128xbf16>
    %16 = vector.shape_cast %13 : vector<8x128xbf16> to vector<1x8x128xbf16>
    tpu.vector_store %arg13[%c0_9, %c0_10, %c0_11], %16 {strides = array<i32>} : memref<1x8x128xbf16, #tpu.memory_space<vmem>>, vector<1x8x128xbf16>,
    %c0_12 = arith.constant 0 : index
    %c0_13 = arith.constant 0 : index
    %c0_14 = arith.constant 0 : index
    %17 = vector.load %arg4[%c0_12, %c0_13, %c0_14] : memref<1x1x128xf32, #tpu.memory_space<vmem>>, vector<1x1x128xf32>
    %18 = vector.shape_cast %17 : vector<1x1x128xf32> to vector<1x128xf32>
    %19 = vector.broadcast %18 : vector<1x128xf32> to vector<8x128xf32>
    %20 = arith.addf %12, %19 : vector<8x128xf32>
    %21 = arith.truncf %20 : vector<8x128xf32> to vector<8x128xbf16>
    %c0_15 = arith.constant 0 : index
    %c0_16 = arith.constant 0 : index
    %22 = vector.load %arg7[%c0_15, %c0_16] : memref<128x128xbf16, #tpu.memory_space<vmem>>, vector<128x128xbf16>
    %cst_17 = arith.constant dense<0.000000e+00> : vector<8x128xf32>
    %23 = tpu.matmul %21, %22, %cst_17 {dimension_numbers = #tpu.dot_dimension_numbers<[1], [0], [0], [1], [0, 0, 1, 1], [], []>} : vector<8x128xbf16>, vector<128x128xbf16>, vector<8x128xf32> -> vector<8x128xf32>
    %c0_18 = arith.constant 0 : index
    %c0_19 = arith.constant 0 : index
    %24 = vector.load %arg8[%c0_18, %c0_19] : memref<1x128xf32, #tpu.memory_space<vmem>>, vector<1x128xf32>
    %25 = vector.broadcast %24 : vector<1x128xf32> to vector<8x128xf32>
    %26 = arith.addf %23, %25 : vector<8x128xf32>
    %27 = arith.truncf %26 : vector<8x128xf32> to vector<8x128xbf16>
    %c0_20 = arith.constant 0 : index
    %c0_21 = arith.constant 0 : index
    %c0_22 = arith.constant 0 : index
    %28 = vector.load %arg15[%c0_20, %c0_21, %c0_22] : memref<1x8x128xbf16, #tpu.memory_space<vmem>>, vector<1x8x128xbf16>
    %29 = vector.shape_cast %28 : vector<1x8x128xbf16> to vector<8x128xbf16>
    %30 = vector.shape_cast %27 : vector<8x128xbf16> to vector<1x8x128xbf16>
    tpu.vector_store %arg15[%c0_20, %c0_21, %c0_22], %30 {strides = array<i32>} : memref<1x8x128xbf16, #tpu.memory_space<vmem>>, vector<1x8x128xbf16>,
    %31 = vector.extract_strided_slice %26 {offsets = [0, 0], sizes = [8, 1], strides = [1, 1]} : vector<8x128xf32> to vector<8x1xf32>
    %c0_23 = arith.constant 0 : index
    %c0_24 = arith.constant 0 : index
    %32 = vector.load %arg9[%c0_23, %c0_24] : memref<1x128xf32, #tpu.memory_space<vmem>>, vector<1x128xf32>
    %33 = vector.broadcast %31 : vector<8x1xf32> to vector<8x128xf32>
    %34 = vector.broadcast %32 : vector<1x128xf32> to vector<8x128xf32>
    %35 = arith.mulf %33, %34 : vector<8x128xf32>
    %c0_25 = arith.constant 0 : index
    %c0_26 = arith.constant 0 : index
    %36 = vector.load %arg10[%c0_25, %c0_26] : memref<1x128xf32, #tpu.memory_space<vmem>>, vector<1x128xf32>
    %37 = vector.broadcast %36 : vector<1x128xf32> to vector<8x128xf32>
    %38 = arith.addf %35, %37 : vector<8x128xf32>
    %c0_27 = arith.constant 0 : index
    %c0_28 = arith.constant 0 : index
    %39 = vector.load %arg11[%c0_27, %c0_28] : memref<1x128xf32, #tpu.memory_space<vmem>>, vector<1x128xf32>
    %40 = vector.broadcast %31 : vector<8x1xf32> to vector<8x128xf32>
    %41 = vector.broadcast %39 : vector<1x128xf32> to vector<8x128xf32>
    %42 = arith.mulf %40, %41 : vector<8x128xf32>
    %43 = arith.addf %38, %42 : vector<8x128xf32>
    %c0_29 = arith.constant 0 : index
    %c0_30 = arith.constant 0 : index
    %44 = vector.load %arg12[%c0_29, %c0_30] : memref<1x128xf32, #tpu.memory_space<vmem>>, vector<1x128xf32>
    %45 = vector.broadcast %44 : vector<1x128xf32> to vector<8x128xf32>
    %46 = arith.addf %43, %45 : vector<8x128xf32>
    %47 = arith.addf %20, %46 : vector<8x128xf32>
    %48 = arith.truncf %47 : vector<8x128xf32> to vector<8x128xbf16>
    %c0_31 = arith.constant 0 : index
    %c0_32 = arith.constant 0 : index
    %c0_33 = arith.constant 0 : index
    %49 = vector.load %arg14[%c0_31, %c0_32, %c0_33] : memref<1x8x128xbf16, #tpu.memory_space<vmem>>, vector<1x8x128xbf16>
    %50 = vector.shape_cast %49 : vector<1x8x128xbf16> to vector<8x128xbf16>
    %51 = vector.shape_cast %48 : vector<8x128xbf16> to vector<1x8x128xbf16>
    tpu.vector_store %arg14[%c0_31, %c0_32, %c0_33], %51 {strides = array<i32>} : memref<1x8x128xbf16, #tpu.memory_space<vmem>>, vector<1x8x128xbf16>,
    return
  }
  func.func @transform_0(%arg0: i32, %arg1: i32) -> (i32, i32, i32) {
    %c0_i32 = arith.constant 0 : i32
    %c0_i32_0 = arith.constant 0 : i32
    return %arg0, %arg1, %c0_i32 : i32, i32, i32
  }
  func.func @transform_1(%arg0: i32, %arg1: i32) -> (i32, i32, i32) {
    %c0_i32 = arith.constant 0 : i32
    %c0_i32_0 = arith.constant 0 : i32
    return %arg0, %arg1, %c0_i32 : i32, i32, i32
  }
  func.func @transform_2(%arg0: i32, %arg1: i32) -> (i32, i32, i32) {
    %c0_i32 = arith.constant 0 : i32
    %c0_i32_0 = arith.constant 0 : i32
    %c0_i32_1 = arith.constant 0 : i32
    return %arg0, %c0_i32, %c0_i32_0 : i32, i32, i32
  }
  func.func @transform_3(%arg0: i32, %arg1: i32) -> (i32, i32) {
    %c0_i32 = arith.constant 0 : i32
    %c0_i32_0 = arith.constant 0 : i32
    %c0_i32_1 = arith.constant 0 : i32
    return %c0_i32, %c0_i32_0 : i32, i32
  }
  func.func @transform_4(%arg0: i32, %arg1: i32) -> (i32, i32) {
    %c0_i32 = arith.constant 0 : i32
    %c0_i32_0 = arith.constant 0 : i32
    %c0_i32_1 = arith.constant 0 : i32
    return %c0_i32, %c0_i32_0 : i32, i32
  }
  func.func @transform_5(%arg0: i32, %arg1: i32) -> (i32, i32) {
    %c0_i32 = arith.constant 0 : i32
    %c0_i32_0 = arith.constant 0 : i32
    %c0_i32_1 = arith.constant 0 : i32
    return %c0_i32, %c0_i32_0 : i32, i32
  }
  func.func @transform_6(%arg0: i32, %arg1: i32) -> (i32, i32) {
    %c0_i32 = arith.constant 0 : i32
    %c0_i32_0 = arith.constant 0 : i32
    %c0_i32_1 = arith.constant 0 : i32
    return %c0_i32, %c0_i32_0 : i32, i32
  }
  func.func @transform_7(%arg0: i32, %arg1: i32) -> (i32, i32) {
    %c0_i32 = arith.constant 0 : i32
    %c0_i32_0 = arith.constant 0 : i32
    %c0_i32_1 = arith.constant 0 : i32
    return %c0_i32, %c0_i32_0 : i32, i32
  }
  func.func @transform_8(%arg0: i32, %arg1: i32) -> (i32, i32) {
    %c0_i32 = arith.constant 0 : i32
    %c0_i32_0 = arith.constant 0 : i32
    %c0_i32_1 = arith.constant 0 : i32
    return %c0_i32, %c0_i32_0 : i32, i32
  }
  func.func @transform_9(%arg0: i32, %arg1: i32) -> (i32, i32) {
    %c0_i32 = arith.constant 0 : i32
    %c0_i32_0 = arith.constant 0 : i32
    %c0_i32_1 = arith.constant 0 : i32
    return %c0_i32, %c0_i32_0 : i32, i32
  }
  func.func @transform_10(%arg0: i32, %arg1: i32) -> (i32, i32) {
    %c0_i32 = arith.constant 0 : i32
    %c0_i32_0 = arith.constant 0 : i32
    %c0_i32_1 = arith.constant 0 : i32
    return %c0_i32, %c0_i32_0 : i32, i32
  }
  func.func @transform_11(%arg0: i32, %arg1: i32) -> (i32, i32, i32) {
    %c0_i32 = arith.constant 0 : i32
    %c0_i32_0 = arith.constant 0 : i32
    return %arg0, %arg1, %c0_i32 : i32, i32, i32
  }
  func.func @transform_12(%arg0: i32, %arg1: i32) -> (i32, i32, i32) {
    %c0_i32 = arith.constant 0 : i32
    %c0_i32_0 = arith.constant 0 : i32
    return %arg0, %arg1, %c0_i32 : i32, i32, i32
  }
  func.func @transform_13(%arg0: i32, %arg1: i32) -> (i32, i32, i32) {
    %c0_i32 = arith.constant 0 : i32
    %c0_i32_0 = arith.constant 0 : i32
    return %arg0, %arg1, %c0_i32 : i32, i32, i32
  }
}

</mosaic_0001>

<bundles_post_ra>
// kernel: tpu_custom_call.1
= control target key start
LH: loop header
LB: loop body
LE: loop exit
PB: predicated region body
PF: predicated region fallthrough
CT: control target
= control target key end

     0   :  { %s1703_s0 = inlined_call_operand.vmem [shape: f32[2,8,128], index: 0, kind: input, shape index: {}]   ;;  %s1704_s1 = inlined_call_operand.vmem [shape: f32[2,8,1], index: 1, kind: input, shape index: {}]   ;;  %s1705_s2 = inlined_call_operand.vmem [shape: f32[2,1,128], index: 2, kind: input, shape index: {}]   ;;  %s1706_s3 = inlined_call_operand.hbm [shape: bf16[128,128], index: 3, kind: input, shape index: {}]   ;;  %s1707_s4 = inlined_call_operand.vmem [shape: f32[1,128], index: 4, kind: input, shape index: {}]   ;;  %s1708_s5 = inlined_call_operand.hbm [shape: bf16[128,128], index: 5, kind: input, shape index: {}]   ;;  %s1709_s6 = inlined_call_operand.vmem [shape: f32[1,128], index: 6, kind: input, shape index: {}]   ;;  %s1710_s7 = inlined_call_operand.vmem [shape: f32[1,128], index: 7, kind: input, shape index: {}]   ;;  %s1711_s8 = inlined_call_operand.vmem [shape: f32[1,128], index: 8, kind: input, shape index: {}]   ;;  %s1712_s9 = inlined_call_operand.vmem [shape: f32[1,128], index: 9, kind: input, shape index: {}]   ;;  %s1713_s10 = inlined_call_operand.vmem [shape: f32[1,128], index: 10, kind: input, shape index: {}]   ;;  %s1714_s11 = inlined_call_operand.hbm [shape: bf16[2,8,128], index: 11, kind: output, shape index: {0}]   ;;  %s1715_s12 = inlined_call_operand.hbm [shape: bf16[2,8,128], index: 12, kind: output, shape index: {1}]   ;;  %s1716_s13 = inlined_call_operand.hbm [shape: bf16[2,8,128], index: 13, kind: output, shape index: {2}]  }
   0x1   :  { %1725 = sst [smem:[#allocation22_spill]] %s1703_s0 }
   0x2   :  { %1726 = sst [smem:[#allocation23_spill]] %s1704_s1 }
   0x3   :  { %19 = vsyncpa [#allocation3], 0 }
   0x4   :  { %20 = vsyncpa [#allocation6], 0 }
   0x5   :  { %21 = vsyncpa [#allocation4], 0 }
   0x6   :  { %23 = vsyncpa [#allocation4 + $0x1], 0 }
   0x7   :  { %24 = vsyncpa [#allocation9], 0 }
   0x8   :  { %26 = vsyncpa [#allocation9 + $0x1], 0  ;;  %s1493_s25 = smov 0   ;;  %s1495_s26 = smov 0  }
   0x9   :  { %s1497_s27 = smov 0   ;;  %s1499_s28 = smov 0  }
   0xa   :  { %s1501_s29 = smov 0   ;;  %s1503_s30 = smov 0  }
   0xb LB: > { %1727 = sst [smem:[#allocation15_spill]] %s1396_s25  ;;  %s1524_s14 = sadd.s32 4294967295, %s1416_s30   ;;  %s1416_s30 = sphi %s1503_s30, %s32_s30   ;;  %s1412_s29 = sphi %s1501_s29, %s1746_s29   ;;  %s1408_s28 = sphi %s1499_s28, %s1745_s28   ;;  %s1404_s27 = sphi %s1497_s27, %s1744_s27   ;;  %s1400_s26 = sphi %s1495_s26, %s1748_s26   ;;  %s1396_s25 = sphi %s1493_s25, %s1747_s25  }
   0xc   : > { %1728 = sst [smem:[#allocation16_spill]] %s1404_s27  ;;  %s1717_s15 = sadd.s32 4294967294, %s1416_s30  }
   0xd   : > { %1729 = sst [smem:[#allocation17_spill]] %s1412_s29  ;;  %s44_s16 = sadd.s32 1, %s1412_s29 }
   0xe   : > { %1730 = sst [smem:[#allocation18_spill]] %s1416_s30  ;;  %s303_s17 = sadd.s32 1, %s1404_s27 }
   0xf   : > { %p46_p0 = scmp.ge.s32.totalorder %s44_s16, 2  ;;  %p313_p1 = scmp.ne.s32.totalorder %s1404_s27, %s1400_s26 }
  0x10   : > { %p314_p2 = scmp.eq.s32.totalorder %s1524_s14, 1  ;;  %p319_p3 = scmp.ne.s32.totalorder %s1400_s26, %s1396_s25 }
  0x11   : > { %s1750_s16 = smov (%p46_p0, %s44_s16), 0  ;;  %p320_p5 = scmp.eq.s32.totalorder %s1717_s15, 1 }
  0x12   : > { %1731 = sst [smem:[#allocation19_spill]] %s1750_s16  ;;  %p1536_p4 = por %p314_p2, %p313_p1 }
  0x13   : > { %s298_s19 = ssub.s32 %s1412_s29, %s1750_s16  ;;  %p1011_p6 = scmp.ge.s32.totalorder %s1416_s30, 1 }
  0x14   : > { %p301_p7 = scmp.eq.s32.totalorder %s298_s19, 0  ;;  %p1545_p8 = por %p320_p5, %p319_p3 }
  0x15   : > { %p383_p9 = scmp.lt.s32.totalorder %s1416_s30, 3  ;;  %p1142_p11 = scmp.eq.s32.totalorder %s1524_s14, 0 }
  0x16   : > { %s1733_s20 = scalar_select %p1545_p8, 1, 0 }
  0x17   : > { %s1551_s21 = scalar_select %p301_p7, %s1404_s27, %s303_s17  }
  0x18   : > { %1734 = sst [smem:[#allocation20_spill]] %s1733_s20  ;;  %p1553_p10 = pnand %p1011_p6, %p383_p9 }
  0x19   : > { %1735 = sst [smem:[#allocation21_spill]] %s1551_s21  ;;  %s394_s15 = sshll.u32 %s1706_s3, 4  ;;  %s395_s15 = int_to_ptr.hbm [resolvable:$true] %s394_s15 }
  0x1a   : > { %p1125_p12 = pneg %p1553_p10  ;;  %s1418_s19 = smov [#allocation2]  }
  0x1b   : > { %s396_s16 = sshll.u32 %s1418_s19, 4  ;;  %s411_s21 = sshll.u32 %s1708_s5, 4  ;;  %s397_s16 = int_to_ptr.vmem [resolvable:$true] %s396_s16  ;;  %s412_s21 = int_to_ptr.hbm [resolvable:$true] %s411_s21 }
  0x1c   : > { %p1126_p13 = pnand %p1142_p11, %p1125_p12  ;;  %s1419_s27 = smov 64  }
  0x1d   : > { %s1420_s20 = smov 4   ;;  %s1421_s25 = smov [#allocation5]  }
  0x1e   : > { %1128 = dma.hbm_to_vmem [thread:$0]  (!%p1126_p13), %s395_s15, 1024, %s397_s16, [#allocation3], %s1419_s27, %s1419_s27, %s1420_s20  }
  0x1f   : > { %s413_s30 = sshll.u32 %s1421_s25, 4  ;;  %470 = sbr.rel (%p1553_p10) target bundleno = 482 (0x1e2), region = 64  ;;  %s414_s30 = int_to_ptr.vmem [resolvable:$true] %s413_s30 }
  0x20   : > { %1131 = dma.hbm_to_vmem [thread:$0]  (!%p1126_p13), %s412_s21, 1024, %s414_s30, [#allocation6], %s1419_s27, %s1419_s27, %s1420_s20  }
  0x24   : > { %1379 = dma.done.wait (%p1142_p11), [#allocation3], 1024  }
  0x25   : > { %1381 = vsyncadd (%p1142_p11), [#allocation3], 4294966272 }
  0x26   : > { %1383 = dma.done.wait (%p1142_p11), [#allocation6], 1024  }
  0x27   : > { %1385 = vsyncadd (%p1142_p11), [#allocation6], 4294966272  ;;  %p542_p0 = scmp.lt.s32.totalorder %s1408_s28, 1  ;;  %v1102_v0 = vld [vmem:[#allocation2 + $0x38] sm:$0xff]  ;;  %s1737_s1 = sld [smem:[#allocation23_spill]]  ;;  %v1101_v1 = vld [vmem:[#allocation2 + $0x30] sm:$0xff] }
  0x28   : > { %630 = vmatpush.bf16.msra.mxu0 %v1102_v0  ;;  %v1422_v2 = vmov 0   ;;  %v1110_v4 = vld [vmem:[#allocation5 + $0x38] sm:$0xff]  ;;  %v1100_v5 = vld [vmem:[#allocation2 + $0x28] sm:$0xff]  ;;  %v1109_v6 = vld [vmem:[#allocation5 + $0x30] sm:$0xff]  ;;  %s1738_s0 = sld [smem:[#allocation22_spill]]  ;;  %s1604_s16 = sshll.u32 %s1408_s28, 2 }
  0x29   : > { %s1580_s25 = scalar_select %p542_p0, %s1408_s28, 1  ;;  %1200 = vset.pattern.permute.xlu0 %v1422_v2  ;;  %726 = vmatpush.bf16.msra.mxu1 %v1110_v4  ;;  %v1108_v7 = vld [vmem:[#allocation5 + $0x28] sm:$0xff]  ;;  %v1099_v8 = vld [vmem:[#allocation2 + $0x20] sm:$0xff]  ;;  %v1098_v10 = vld [vmem:[#allocation2 + $0x18] sm:$0xff] }
  0x2a   : > { %v1107_v9 = vld [vmem:[#allocation5 + $0x20] sm:$0xff]  ;;  %v1097_v11 = vld [vmem:[#allocation2 + $0x10] sm:$0xff]  ;;  %v1096_v12 = vld [vmem:[#allocation2 + $0x8] sm:$0xff]  ;;  %s792_s22 = scalar_lea.hbm %s1714_s11, %s1604_s16  ;;  %s1290_s20 = scalar_lea.hbm %s1714_s11, 8 }
  0x2b   : > { %s1021_s27 = sshll.u32 %s1580_s25, 3  ;;  %v1095_v13 = vld [vmem:[#allocation2] sm:$0xff]  ;;  %s558_s24 = scalar_lea.vmem %s1705_s2, %s1580_s25  ;;  %v1106_v16 = vld [vmem:[#allocation5 + $0x18] sm:$0xff]  ;;  %v1105_v17 = vld [vmem:[#allocation5 + $0x10] sm:$0xff] }
  0x2c   : > { %631 = vmatpush.bf16.msra.mxu0 %v1101_v1  ;;  %v1104_v18 = vld [vmem:[#allocation5 + $0x8] sm:$0xff]  ;;  %v1103_v19 = vld [vmem:[#allocation5] sm:$0xff]  ;;  %s796_s19 = sshll.u32 %s792_s22, 4  ;;  %s797_s19 = int_to_ptr.hbm [resolvable:$true] %s796_s19 }
  0x2d   : > { %s555_s15 = scalar_lea.vmem %s1737_s1, %s1021_s27  ;;  %727 = vmatpush.bf16.msra.mxu1 %v1109_v6  ;;  %v1201_v20 = vld [vmem:[%s1707_s4] ss:$0 sm:$0xff]  ;;  %s1284_s30 = sshra.s32 %s797_s19, 4  ;;  %s1285_s30 = int_to_ptr.hbm [resolvable:$true] %s1284_s30 }
  0x2e   : > { %v560_v3 = vld [vmem:[%s555_s15] sm:$0xff]  ;;  %s548_s21 = scalar_lea.vmem %s1738_s0, %s1021_s27  ;;  %s525_s27 = sand.u32 1, %s1400_s26  }
  0x2f   : > { %646 = vperm.xlu0 %1200, %v560_v3   ;;  %v559_v14 = vld [vmem:[%s548_s21] sm:$0xff]  ;;  %s1597_s25 = sshll.u32 %s525_s27, 2  ;;  %s771_s17 = scalar_lea.sflag [#allocation4], %s525_s27 }
  0x30   : > { %632 = vmatpush.bf16.msra.mxu0 %v1100_v5  ;;  %v561_v15 = vpack.c.bf16 %v559_v14, %v559_v14  ;;  %v1202_v25 = vld [vmem:[%s558_s24] ss:$0 sm:$0xff]  ;;  %s527_s29 = scalar_lea.vmem [#allocation7], %s1597_s25  ;;  %s541_s23 = scalar_lea.vmem [#allocation10], %s1597_s25 }
  0x31   : > { %728 = vmatpush.bf16.msra.mxu1 %v1108_v7  ;;  %v1203_v31 = vld [vmem:[%s1709_s6] ss:$0 sm:$0xff]  ;;  %s794_s24 = sshll.u32 %s527_s29, 4  ;;  %s1286_s15 = scalar_lea.hbm %s1285_s30, 4  ;;  %s795_s24 = int_to_ptr.vmem [resolvable:$true] %s794_s24 }
  0x32   : > { %p1287_p1 = scmp.ne.s32.totalorder %s1285_s30, %s1286_s15  ;;  %p1291_p5 = scmp.lt.s32.totalorder %s1285_s30, %s1714_s11 }
  0x33   : > { %p1292_p6 = scmp.lt.s32.totalorder %s1290_s20, %s1286_s15 }
  0x34   : > { %633 = vmatpush.bf16.msra.mxu0 %v1099_v8  ;;  %p1288_p2 = pnand %p1287_p1, %p1536_p4 }
  0x35   : > { %729 = vmatpush.bf16.msra.mxu1 %v1107_v9  ;;  %p1293_p7 = por %p1292_p6, %p1291_p5 }
  0x36   : > { %p1289_p3 = pneg %p1288_p2 }
  0x38   : > { %634 = vmatpush.bf16.msra.mxu0 %v1098_v10  ;;  %p1294_p9 = pnand %p1293_p7, %p1289_p3 }
  0x39   : > { %730 = vmatpush.bf16.msra.mxu1 %v1106_v16 }
  0x3c   : > { %635 = vmatpush.bf16.msra.mxu0 %v1097_v11 }
  0x3d   : > { %731 = vmatpush.bf16.msra.mxu1 %v1105_v17 }
  0x40   : > { %636 = vmatpush.bf16.msra.mxu0 %v1096_v12 }
  0x41   : > { %732 = vmatpush.bf16.msra.mxu1 %v1104_v18 }
  0x44   : > { %637 = vmatpush.bf16.msra.mxu0 %v1095_v13 }
  0x45   : > { %733 = vmatpush.bf16.msra.mxu1 %v1103_v19 }
  0x47   : > { %638 = vmatmul.bf16.vlgmr.msra.gmra.mxu0 %v561_v15 }
  0xa1   : > { %v647_v23 = vpop.permute.xlu0 %646 }
  0xc4   : > { %v639_v21 = vpop.f32.mrf.mxu0 }
  0xc5   : > { %v640_v22 = vadd.f32 %v1201_v20, %v639_v21 }
  0xc7   : > { %1208 = vtanh.f32 %v640_v22 }
  0xcc   : > { %v641_v24 = vpop.f32.mrf.mxu0 }
  0xcd   : > { %v1209_v26 = vpop.eup %1208 }
  0xce   : > { %v649_v27 = vmul.f32 %v1209_v26, %v647_v23 }
  0xd0   : > { %v650_v28 = vpack.c.bf16 %v649_v27, %v649_v27  ;;  %v656_v29 = vadd.f32 %v1202_v25, %v649_v27 }
  0xd2   : > { %v657_v30 = vpack.c.bf16 %v656_v29, %v656_v29  ;;  %651 = vst [vmem:[%s527_s29] sm:$0xf] %v650_v28 }
  0xd4   : > { %734 = vmatmul.bf16.vlgmr.msra.gmra.mxu1 %v657_v30 }
 0x151   : > { %v735_v32 = vpop.f32.mrf.mxu1 }
 0x152   : > { %v736_v33 = vadd.f32 %v1203_v31, %v735_v32 }
 0x154   : > { %v739_v34 = vpack.c.bf16 %v736_v33, %v736_v33  ;;  %744 = vperm.xlu0 %1200, %v736_v33  }
 0x156   : > { %740 = vst [vmem:[%s541_s23] sm:$0xf] %v739_v34 }
 0x157   : > { %1297 = shalt.err (!%p1294_p9)
}
 0x158   : > { %1119 = dma.vmem_to_hbm [thread:$0]  (%p1536_p4), %s795_s24, 64, %s797_s19, %s771_s17   ;;  %v1204_v36 = vld [vmem:[%s1710_s7] ss:$0 sm:$0xff] }
 0x159   : > { %v737_v35 = vpop.f32.mrf.mxu1  ;;  %v1205_v37 = vld [vmem:[%s1711_s8] ss:$0 sm:$0xff]  ;;  %s807_s17 = scalar_lea.hbm %s1715_s12, %s1604_s16  ;;  %s822_s27 = scalar_lea.hbm %s1716_s13, %s1604_s16 }
 0x15a   : > { %v1206_v38 = vld [vmem:[%s1712_s9] ss:$0 sm:$0xff]  ;;  %s775_s29 = sand.u32 1, %s1524_s14   ;;  %s534_s0 = scalar_lea.vmem [#allocation8], %s1597_s25 }
 0x15b   : > { %v1207_v41 = vld [vmem:[%s1713_s10] ss:$0 sm:$0xff]  ;;  %s809_s22 = sshll.u32 %s534_s0, 4  ;;  %s811_s1 = sshll.u32 %s807_s17, 4  ;;  %s810_s22 = int_to_ptr.vmem [resolvable:$true] %s809_s22  ;;  %s812_s1 = int_to_ptr.hbm [resolvable:$true] %s811_s1 }
 0x15c   : > { %s1647_s30 = sshll.u32 %s541_s23, 4  ;;  %s1649_s15 = sshll.u32 %s822_s27, 4  ;;  %s825_s30 = int_to_ptr.vmem [resolvable:$true] %s1647_s30  ;;  %s827_s15 = int_to_ptr.hbm [resolvable:$true] %s1649_s15 }
 0x15d   : > { %s776_s16 = scalar_lea.sflag [#allocation9], %s775_s29  ;;  %s1312_s14 = sshra.s32 %s812_s1, 4  ;;  %s1313_s14 = int_to_ptr.hbm [resolvable:$true] %s1312_s14 }
 0x15e   : > { %s1314_s28 = scalar_lea.hbm %s1313_s14, 4  ;;  %s1318_s24 = scalar_lea.hbm %s1715_s12, 8 }
 0x15f   : > { %p1315_p10 = scmp.ne.s32.totalorder %s1313_s14, %s1314_s28  ;;  %p1319_p13 = scmp.lt.s32.totalorder %s1313_s14, %s1715_s12 }
 0x160   : > { %p1320_p0 = scmp.lt.s32.totalorder %s1318_s24, %s1314_s28 }
 0x161   : > { %p1316_p11 = pnand %p1315_p10, %p1536_p4 }
 0x162   : > { %p1321_p1 = por %p1320_p0, %p1319_p13 }
 0x163   : > { %p1317_p12 = pneg %p1316_p11 }
 0x165   : > { %p1322_p2 = pnand %p1321_p1, %p1317_p12 }
 0x1c6   : > { %v745_v39 = vpop.permute.xlu0 %744 }
 0x1c7   : > { %v750_v40 = vmul.f32 %v1204_v36, %v745_v39  ;;  %v760_v43 = vmul.f32 %v1206_v38, %v745_v39 }
 0x1c9   : > { %v755_v42 = vadd.f32 %v1205_v37, %v750_v40 }
 0x1cb   : > { %v761_v44 = vadd.f32 %v760_v43, %v755_v42 }
 0x1cd   : > { %v766_v45 = vadd.f32 %v1207_v41, %v761_v44 }
 0x1cf   : > { %v767_v46 = vadd.f32 %v766_v45, %v656_v29 }
 0x1d1   : > { %v768_v47 = vpack.c.bf16 %v767_v46, %v767_v46 }
 0x1d3   : > { %769 = vst [vmem:[%s534_s0] sm:$0xf] %v768_v47 }
 0x1d4   : > { %1325 = shalt.err (!%p1322_p2)
}
 0x1d5   : > { %1120 = dma.vmem_to_hbm [thread:$0]  (%p1536_p4), %s810_s22, 64, %s812_s1, %s776_s16  }
 0x1d6   : > { %s1340_s20 = sshra.s32 %s827_s15, 4  ;;  %s1346_s0 = scalar_lea.hbm %s1716_s13, 8  ;;  %s1341_s20 = int_to_ptr.hbm [resolvable:$true] %s1340_s20 }
 0x1d7   : > { %s1342_s21 = scalar_lea.hbm %s1341_s20, 4  ;;  %p1347_p7 = scmp.lt.s32.totalorder %s1341_s20, %s1716_s13 }
 0x1d8   : > { %p1343_p3 = scmp.ne.s32.totalorder %s1341_s20, %s1342_s21  ;;  %p1348_p9 = scmp.lt.s32.totalorder %s1346_s0, %s1342_s21 }
 0x1da   : > { %p1344_p5 = pnand %p1343_p3, %p1536_p4  ;;  %p1349_p10 = por %p1348_p9, %p1347_p7 }
 0x1dc   : > { %p1345_p6 = pneg %p1344_p5 }
 0x1de   : > { %p1350_p11 = pnand %p1349_p10, %p1345_p6 }
 0x1e0   : > { %1353 = shalt.err (!%p1350_p11)
}
 0x1e1   : > { %1121 = dma.vmem_to_hbm [thread:$0]  (%p1536_p4), %s825_s30, 64, %s827_s15, %s776_s16  }
 0x1e2 PF: > { %s1739_s22 = sld [smem:[#allocation18_spill]] }
 0x1e3   : > { %s1740_s1 = sld [smem:[#allocation15_spill]] }
 0x1e8   : > { %p1146_p12 = scmp.ge.s32.totalorder %s1739_s22, 2 }
 0x1e9   : > { %s838_s23 = sand.u32 1, %s1740_s1  }
 0x1ea   : > { %p1133_p13 = pnand %p1146_p12, %p1545_p8  ;;  %s839_s24 = scalar_lea.sflag [#allocation4], %s838_s23 }
 0x1ec   : > { %p1134_p0 = pneg %p1133_p13 }
 0x1ee   : > { %1387 = dma.done.wait (%p1134_p0), %s839_s24, 64  }
 0x1ef   : > { %1389 = vsyncadd (%p1134_p0), %s839_s24, 4294967232  ;;  %s1742_s19 = sadd.s32 4294967294, %s1739_s22  }
 0x1f0   : > { %s848_s18 = sand.u32 1, %s1742_s19  }
 0x1f1   : > { %s849_s17 = scalar_lea.sflag [#allocation9], %s848_s18 }
 0x1f2   : > { %1391 = dma.done.wait (%p1134_p0), %s849_s17, 128  }
 0x1f3   : > { %1393 = vsyncadd (%p1134_p0), %s849_s17, 4294967168  ;;  %s32_s30 = sadd.s32 1, %s1739_s22   ;;  %s1743_s15 = sld [smem:[#allocation16_spill]] }
 0x1f4   : > { %p29_p4 = scmp.ge.s32.totalorder %s32_s30, 4   ;;  %s1744_s27 = sld [smem:[#allocation21_spill]] }
 0x1f5   : > { %s1745_s28 = sld [smem:[#allocation17_spill]]  ;;  %s1747_s25 = smov %s1400_s26 }
 0x1f6   : > { %s1746_s29 = sld [smem:[#allocation19_spill]]  ;;  %31 = sbr.rel (!%p29_p4) target bundleno = 11 (0xb), region = 146 }
 0x1f9   : > { %s1748_s26 = smov %s1743_s15 }
 0x1fb   :  { %865 = vsyncpa [#allocation3], 1 }
 0x1fc   :  { %867 = vsyncpa [#allocation3 + $0x1], 1 }
 0x1fd   :  { %868 = vsyncpa [#allocation6], 1 }
 0x1fe   :  { %869 = vsyncpa [#allocation4], 1 }
 0x1ff   :  { %871 = vsyncpa [#allocation4 + $0x1], 1 }
 0x200   :  { %872 = vsyncpa [#allocation9], 1 }
 0x201   :  { %874 = vsyncpa [#allocation9 + $0x1], 1 }

</bundles_post_ra>
